<compile_context>
chip_gen: v7x
topology: tpu7x:2x2x1
jax: 0.10.0
libtpu: 0.0.40
codegen_flags: <defaults>
</compile_context>

<pallas_src>
import math
import numpy as np
import jax
import jax.numpy as jnp
from jax.experimental import pallas as pl
from jax.experimental.pallas import tpu as pltpu

# ---------------- model hyperparameters (small, forward-consistent) ----------
VOCAB_SIZE = 50
D_MODEL = 32
NUM_HEADS = 4
D_K = D_MODEL // NUM_HEADS
D_FF = 32            # must equal D_MODEL (second residual, see note above)
OUTPUT_SIZE = 8
MAX_SEQ_LEN = 64
BATCH = 2
SEQ = 8
BT = BATCH * SEQ     # flattened batch*seq rows processed in one kernel call
HBT = NUM_HEADS * BT # heads stacked along the sublane axis
LN_EPS = 1e-5

assert D_FF == D_MODEL, "second residual (x + ff(x)) requires d_ff == d_model"

VOCAB_PAD = 64                   # vocab padded to a multiple of 16 (bf16 sublane tile)
W_LANES = 4 * D_MODEL            # 128-lane slab

# -------- packed-weight row layout (one bf16 slab, 128 lanes) ----------------
# All region row offsets are multiples of 16 (bf16 sublane tiling).
R_TBL = 0                        # (VOCAB_PAD, 128)  [Emb | Emb @ Wqkv(scaled)]
R_CONST = R_TBL + VOCAB_PAD      # (BT, 128)         [Pos | Pos @ Wqkv + bqkv]
R_HMASK = R_CONST + BT           # (HBT, D_MODEL)    0/1 head-lane mask
R_SBIAS = R_HMASK + HBT          # (HBT, BT)         additive block-diag mask (0 / -1e30)
R_WO = R_SBIAS + HBT             # (D_MODEL, D_MODEL)
R_WFF = R_WO + D_MODEL           # (D_MODEL, D_FF)
R_WOUT = R_WFF + D_MODEL         # (D_FF, 128)       output proj, lane-padded
R_BIAS = R_WOUT + D_FF           # 3 rows: [bo|g1|be1|bff], [g2|be2|.], [bout|.]
N_ROWS = ((R_BIAS + 3 + 15) // 16) * 16   # 320


def _layer_norm(x, gamma, beta):
    # PyTorch nn.LayerNorm: biased variance, eps inside sqrt
    mean = jnp.mean(x, axis=-1, keepdims=True)
    var = jnp.mean((x - mean) ** 2, axis=-1, keepdims=True)
    return (x - mean) * jax.lax.rsqrt(var + LN_EPS) * gamma + beta


# ------------------------------- the kernel ----------------------------------
def transformer_kernel(tok_ref, w_ref, o_ref):
    f32 = jnp.float32
    bf16 = jnp.bfloat16

    # ---- fused embedding gather + positional enc + QKV projection ----------
    tok = tok_ref[...]                                               # (BT, 1) i32
    vocab_ids = jax.lax.broadcasted_iota(jnp.int32, (BT, VOCAB_PAD), 1)
    onehot = (vocab_ids == tok).astype(bf16)                         # (BT, VOCAB_PAD)
    tbl = w_ref[R_TBL:R_TBL + VOCAB_PAD, :]                          # (VOCAB_PAD, 128) bf16
    const = w_ref[R_CONST:R_CONST + BT, :].astype(f32)               # (BT, 128)
    xq = jnp.dot(onehot, tbl, preferred_element_type=f32) + const    # (BT, 128) f32

    x = xq[:, 0:D_MODEL]                                             # (BT, D)
    q = xq[:, D_MODEL:2 * D_MODEL]                                   # pre-scaled by 1/sqrt(d_k)
    k = xq[:, 2 * D_MODEL:3 * D_MODEL]
    v = xq[:, 3 * D_MODEL:4 * D_MODEL]

    # ---- all heads at once: heads stacked along sublanes, constant masks ----
    hmask = w_ref[R_HMASK:R_HMASK + HBT, 0:D_MODEL].astype(f32)      # (HBT, D)  0/1
    sbias = w_ref[R_SBIAS:R_SBIAS + HBT, 0:BT].astype(f32)           # (HBT, BT) 0/-1e30

    q_stk = (jnp.concatenate([q] * NUM_HEADS, axis=0) * hmask).astype(bf16)
    # scores[h*BT + i, j] = q_h[i] . k_h[j]   (already scaled) + block-diag bias
    scores = jax.lax.dot_general(q_stk, k.astype(bf16), (((1,), (1,)), ((), ())),
                                 preferred_element_type=f32) + sbias  # (HBT, BT)
    scores = scores - jnp.max(scores, axis=-1, keepdims=True)
    p = jnp.exp(scores)
    p = p * pl.reciprocal(jnp.sum(p, axis=-1, keepdims=True), approx=True)

    o_stk = jnp.dot(p.astype(bf16), v.astype(bf16),
                    preferred_element_type=f32) * hmask              # (HBT, D)
    attn = o_stk[0:BT]
    for h in range(1, NUM_HEADS):          # 3 sublane-aligned adds, no relayout
        attn = attn + o_stk[h * BT:(h + 1) * BT]                     # (BT, D)

    # ---- biases / LN params: 3 coalesced rows, one load ---------------------
    brow = w_ref[R_BIAS:R_BIAS + 3, :].astype(f32)                   # (3, 128)
    bo = brow[0:1, 0:D_MODEL]
    g1 = brow[0:1, D_MODEL:2 * D_MODEL]
    be1 = brow[0:1, 2 * D_MODEL:3 * D_MODEL]
    bff = brow[0:1, 3 * D_MODEL:4 * D_MODEL]
    g2 = brow[1:2, 0:D_MODEL]
    be2 = brow[1:2, D_MODEL:2 * D_MODEL]
    bout = brow[2:3, :]                                              # (1, 128)

    wo = w_ref[R_WO:R_WO + D_MODEL, 0:D_MODEL]                       # bf16
    attn = jnp.dot(attn.astype(bf16), wo, preferred_element_type=f32) + bo

    # ---- residual + norm1 ----
    x1 = _layer_norm(x + attn, g1, be1)

    # ---- feed-forward (Linear + ReLU), residual + norm2 ----
    wff = w_ref[R_WFF:R_WFF + D_MODEL, 0:D_FF]
    ff = jnp.maximum(jnp.dot(x1.astype(bf16), wff, preferred_element_type=f32) + bff, 0.0)
    x2 = _layer_norm(x1 + ff, g2, be2)

    # ---- output projection (lane-padded to 128 -> unmasked store) ----
    wout = w_ref[R_WOUT:R_WOUT + D_FF, :]                            # (D_FF, 128)
    o_ref[...] = jnp.dot(x2.astype(bf16), wout, preferred_element_type=f32) + bout


# ------------------------------- wrappers ------------------------------------
def transformer_pallas(token_ids, w_packed):
    """token_ids: (B, T) int32; w_packed: (N_ROWS, 128) bf16 -> (B, T, OUT)."""
    B, T = token_ids.shape
    assert B == BATCH and T == SEQ
    tok = token_ids.reshape(BT, 1).astype(jnp.int32)
    out = pl.pallas_call(
        transformer_kernel,
        out_shape=jax.ShapeDtypeStruct((BT, W_LANES), jnp.float32),
        in_specs=[pl.BlockSpec(memory_space=pltpu.MemorySpace.VMEM),
                  pl.BlockSpec(memory_space=pltpu.MemorySpace.VMEM)],
        out_specs=pl.BlockSpec(memory_space=pltpu.MemorySpace.VMEM),
    )(tok, w_packed)
    return out[:, :OUTPUT_SIZE].reshape(B, T, OUTPUT_SIZE)


def make_positional_encoding(max_len, d_model):
    position = jnp.arange(max_len, dtype=jnp.float32)[:, None]
    div_term = jnp.exp(jnp.arange(0, d_model, 2, dtype=jnp.float32)
                       * (-np.log(10000.0) / d_model))
    pe = jnp.zeros((max_len, d_model), dtype=jnp.float32)
    pe = pe.at[:, 0::2].set(jnp.sin(position * div_term))
    pe = pe.at[:, 1::2].set(jnp.cos(position * div_term))
    return pe[None]                       # (1, max_len, d_model)


def init_params(key):
    ks = jax.random.split(key, 8)
    s = 0.02
    return {
        "embedding": jax.random.normal(ks[0], (VOCAB_SIZE, D_MODEL), jnp.float32) * s,
        "wq": jax.random.normal(ks[1], (D_MODEL, D_MODEL), jnp.float32) * s,
        "bq": jnp.zeros((1, D_MODEL), jnp.float32),
        "wk": jax.random.normal(ks[2], (D_MODEL, D_MODEL), jnp.float32) * s,
        "bk": jnp.zeros((1, D_MODEL), jnp.float32),
        "wv": jax.random.normal(ks[3], (D_MODEL, D_MODEL), jnp.float32) * s,
        "bv": jnp.zeros((1, D_MODEL), jnp.float32),
        "wo": jax.random.normal(ks[4], (D_MODEL, D_MODEL), jnp.float32) * s,
        "bo": jnp.zeros((1, D_MODEL), jnp.float32),
        "g1": jnp.ones((1, D_MODEL), jnp.float32),
        "be1": jnp.zeros((1, D_MODEL), jnp.float32),
        "wff": jax.random.normal(ks[5], (D_MODEL, D_FF), jnp.float32) * s,
        "bff": jnp.zeros((1, D_FF), jnp.float32),
        "g2": jnp.ones((1, D_MODEL), jnp.float32),
        "be2": jnp.zeros((1, D_MODEL), jnp.float32),
        "wout": jax.random.normal(ks[6], (D_FF, OUTPUT_SIZE), jnp.float32) * s,
        "bout": jnp.zeros((1, OUTPUT_SIZE), jnp.float32),
    }


def pack_params(params, pos_encoding):
    """Host-side precompute + packing into one (N_ROWS, 128) bf16 slab."""
    scale = 1.0 / math.sqrt(D_K)
    g = lambda name: np.asarray(params[name], np.float32)

    wqkv = np.concatenate([g("wq") * scale, g("wk"), g("wv")], axis=1)   # (D, 3D)
    bqkv = np.concatenate([g("bq") * scale, g("bk"), g("bv")], axis=1)   # (1, 3D)

    emb = np.zeros((VOCAB_PAD, D_MODEL), np.float32)
    emb[:VOCAB_SIZE] = g("embedding")
    tbl = np.concatenate([emb, emb @ wqkv], axis=1)                      # (VOCAB_PAD, 128)

    pos = np.tile(np.asarray(pos_encoding, np.float32)[0, :SEQ, :], (BATCH, 1))  # (BT, D)
    const = np.concatenate([pos, pos @ wqkv + bqkv], axis=1)             # (BT, 128)

    hmask = np.zeros((HBT, D_MODEL), np.float32)
    for h in range(NUM_HEADS):
        hmask[h * BT:(h + 1) * BT, h * D_K:(h + 1) * D_K] = 1.0

    rows = np.arange(HBT)[:, None]
    cols = np.arange(BT)[None, :]
    qb = (rows % BT) // SEQ
    kb = cols // SEQ
    sbias = np.where(qb == kb, 0.0, -1e30).astype(np.float32)            # (HBT, BT)

    w = np.zeros((N_ROWS, W_LANES), np.float32)
    w[R_TBL:R_TBL + VOCAB_PAD, :] = tbl
    w[R_CONST:R_CONST + BT, :] = const
    w[R_HMASK:R_HMASK + HBT, :D_MODEL] = hmask
    w[R_SBIAS:R_SBIAS + HBT, :BT] = sbias
    w[R_WO:R_WO + D_MODEL, :D_MODEL] = g("wo")
    w[R_WFF:R_WFF + D_MODEL, :D_FF] = g("wff")
    w[R_WOUT:R_WOUT + D_FF, :OUTPUT_SIZE] = g("wout")
    w[R_BIAS, 0:D_MODEL] = g("bo")[0]
    w[R_BIAS, D_MODEL:2 * D_MODEL] = g("g1")[0]
    w[R_BIAS, 2 * D_MODEL:3 * D_MODEL] = g("be1")[0]
    w[R_BIAS, 3 * D_MODEL:4 * D_MODEL] = g("bff")[0]
    w[R_BIAS + 1, 0:D_MODEL] = g("g2")[0]
    w[R_BIAS + 1, D_MODEL:2 * D_MODEL] = g("be2")[0]
    w[R_BIAS + 2, 0:OUTPUT_SIZE] = g("bout")[0]
    return jnp.asarray(w, dtype=jnp.bfloat16)


# --------------------------- pure-JAX reference -------------------------------
def reference_forward(token_ids, params, pos_encoding):
    T = token_ids.shape[1]
    x = jnp.take(params["embedding"], token_ids, axis=0) + pos_encoding[:, :T, :]
    scale = 1.0 / math.sqrt(D_K)
    q = x @ params["wq"] + params["bq"]
    k = x @ params["wk"] + params["bk"]
    v = x @ params["wv"] + params["bv"]
    heads = []
    for h in range(NUM_HEADS):
        sl = slice(h * D_K, (h + 1) * D_K)
        s = jnp.einsum("btd,bsd->bts", q[..., sl], k[..., sl]) * scale
        p = jax.nn.softmax(s, axis=-1)
        heads.append(jnp.einsum("bts,bsd->btd", p, v[..., sl]))
    attn = jnp.concatenate(heads, axis=-1) @ params["wo"] + params["bo"]
    x1 = _layer_norm(x + attn, params["g1"], params["be1"])
    ff = jax.nn.relu(x1 @ params["wff"] + params["bff"])
    x2 = _layer_norm(x1 + ff, params["g2"], params["be2"])
    return x2 @ params["wout"] + params["bout"]


if __name__ == "__main__":
    key = jax.random.PRNGKey(0)
    k_tok, k_param = jax.random.split(key)

    params = init_params(k_param)
    pos_encoding = make_positional_encoding(MAX_SEQ_LEN, D_MODEL)
    token_ids = jax.random.randint(k_tok, (BATCH, SEQ), 0, VOCAB_SIZE, dtype=jnp.int32)

    w_packed = pack_params(params, pos_encoding)
    out = jax.block_until_ready(transformer_pallas(token_ids, w_packed))

    assert out.shape == (BATCH, SEQ, OUTPUT_SIZE)
    assert bool(jnp.all(jnp.isfinite(out)))

    ref = jax.block_until_ready(reference_forward(token_ids, params, pos_encoding))
    np.testing.assert_allclose(np.asarray(out), np.asarray(ref), rtol=5e-2, atol=1e-2)
    print("KERNEL_OK")
</pallas_src>

<mosaic_0001>
module attributes {stable_mosaic.version = 11 : i64} {
  func.func @transformer_kernel(%arg0: memref<16x1xi32, #tpu.memory_space<vmem>>, %arg1: memref<320x128xbf16, #tpu.memory_space<vmem>>, %arg2: memref<16x128xf32, #tpu.memory_space<vmem>>) attributes {dimension_semantics = [], scalar_prefetch = 0 : i64, scratch_operands = 0 : i64, tpu.core_type = #tpu.core_type<tc>} {
    %c0 = arith.constant 0 : index
    %c0_0 = arith.constant 0 : index
    %0 = vector.load %arg0[%c0, %c0_0] : memref<16x1xi32, #tpu.memory_space<vmem>>, vector<16x1xi32>
    %1 = tpu.iota {dimensions = array<i32: 1>} : vector<16x64xi32>
    %2 = vector.broadcast %0 : vector<16x1xi32> to vector<16x64xi32>
    %3 = arith.cmpi eq, %1, %2 : vector<16x64xi32>
    %4 = arith.extui %3 : vector<16x64xi1> to vector<16x64xi32>
    %5 = arith.sitofp %4 : vector<16x64xi32> to vector<16x64xf32>
    %6 = arith.truncf %5 : vector<16x64xf32> to vector<16x64xbf16>
    %c0_1 = arith.constant 0 : index
    %c0_2 = arith.constant 0 : index
    %7 = vector.load %arg1[%c0_1, %c0_2] : memref<320x128xbf16, #tpu.memory_space<vmem>>, vector<64x128xbf16>
    %c64 = arith.constant 64 : index
    %c0_3 = arith.constant 0 : index
    %8 = vector.load %arg1[%c64, %c0_3] : memref<320x128xbf16, #tpu.memory_space<vmem>>, vector<16x128xbf16>
    %9 = arith.extf %8 : vector<16x128xbf16> to vector<16x128xf32>
    %cst = arith.constant dense<0.000000e+00> : vector<16x128xf32>
    %10 = tpu.matmul %6, %7, %cst {dimension_numbers = #tpu.dot_dimension_numbers<[1], [0], [0], [1], [0, 0, 1, 1], [], []>} : vector<16x64xbf16>, vector<64x128xbf16>, vector<16x128xf32> -> vector<16x128xf32>
    %11 = arith.addf %10, %9 : vector<16x128xf32>
    %12 = vector.extract_strided_slice %11 {offsets = [0, 0], sizes = [16, 32], strides = [1, 1]} : vector<16x128xf32> to vector<16x32xf32>
    %13 = vector.extract_strided_slice %11 {offsets = [0, 32], sizes = [16, 32], strides = [1, 1]} : vector<16x128xf32> to vector<16x32xf32>
    %14 = vector.extract_strided_slice %11 {offsets = [0, 64], sizes = [16, 32], strides = [1, 1]} : vector<16x128xf32> to vector<16x32xf32>
    %15 = vector.extract_strided_slice %11 {offsets = [0, 96], sizes = [16, 32], strides = [1, 1]} : vector<16x128xf32> to vector<16x32xf32>
    %c80 = arith.constant 80 : index
    %c0_4 = arith.constant 0 : index
    %16 = vector.load %arg1[%c80, %c0_4] : memref<320x128xbf16, #tpu.memory_space<vmem>>, vector<64x32xbf16>
    %17 = arith.extf %16 : vector<64x32xbf16> to vector<64x32xf32>
    %c144 = arith.constant 144 : index
    %c0_5 = arith.constant 0 : index
    %18 = vector.load %arg1[%c144, %c0_5] : memref<320x128xbf16, #tpu.memory_space<vmem>>, vector<64x16xbf16>
    %19 = arith.extf %18 : vector<64x16xbf16> to vector<64x16xf32>
    %20 = tpu.concatenate %13, %13, %13, %13 in 0 : vector<16x32xf32>, vector<16x32xf32>, vector<16x32xf32>, vector<16x32xf32> -> vector<64x32xf32>
    %21 = arith.mulf %20, %17 : vector<64x32xf32>
    %22 = arith.truncf %21 : vector<64x32xf32> to vector<64x32xbf16>
    %23 = arith.truncf %14 : vector<16x32xf32> to vector<16x32xbf16>
    %cst_6 = arith.constant dense<0.000000e+00> : vector<64x16xf32>
    %24 = tpu.matmul %22, %23, %cst_6 {dimension_numbers = #tpu.dot_dimension_numbers<[1], [1], [0], [0], [0, 0, 1, 0], [], []>} : vector<64x32xbf16>, vector<16x32xbf16>, vector<64x16xf32> -> vector<64x16xf32>
    %25 = arith.addf %24, %19 : vector<64x16xf32>
    %cst_7 = arith.constant dense<0xFF800000> : vector<64xf32>
    %26 = vector.multi_reduction <maximumf>, %25, %cst_7 [1] : vector<64x16xf32> to vector<64xf32>
    %27 = vector.shape_cast %26 : vector<64xf32> to vector<64x1xf32>
    %28 = vector.broadcast %27 : vector<64x1xf32> to vector<64x16xf32>
    %29 = arith.subf %25, %28 : vector<64x16xf32>
    %30 = math.exp %29 : vector<64x16xf32>
    %cst_8 = arith.constant dense<0.000000e+00> : vector<64xf32>
    %31 = vector.multi_reduction <add>, %30, %cst_8 [1] : vector<64x16xf32> to vector<64xf32>
    %32 = vector.shape_cast %31 : vector<64xf32> to vector<64x1xf32>
    %33 = tpu.reciprocal %32 {approx = true} : vector<64x1xf32> -> vector<64x1xf32>
    %34 = vector.broadcast %33 : vector<64x1xf32> to vector<64x16xf32>
    %35 = arith.mulf %30, %34 : vector<64x16xf32>
    %36 = arith.truncf %35 : vector<64x16xf32> to vector<64x16xbf16>
    %37 = arith.truncf %15 : vector<16x32xf32> to vector<16x32xbf16>
    %cst_9 = arith.constant dense<0.000000e+00> : vector<64x32xf32>
    %38 = tpu.matmul %36, %37, %cst_9 {dimension_numbers = #tpu.dot_dimension_numbers<[1], [0], [0], [1], [0, 0, 1, 1], [], []>} : vector<64x16xbf16>, vector<16x32xbf16>, vector<64x32xf32> -> vector<64x32xf32>
    %39 = arith.mulf %38, %17 : vector<64x32xf32>
    %40 = vector.extract_strided_slice %39 {offsets = [0, 0], sizes = [16, 32], strides = [1, 1]} : vector<64x32xf32> to vector<16x32xf32>
    %41 = vector.extract_strided_slice %39 {offsets = [16, 0], sizes = [16, 32], strides = [1, 1]} : vector<64x32xf32> to vector<16x32xf32>
    %42 = arith.addf %40, %41 : vector<16x32xf32>
    %43 = vector.extract_strided_slice %39 {offsets = [32, 0], sizes = [16, 32], strides = [1, 1]} : vector<64x32xf32> to vector<16x32xf32>
    %44 = arith.addf %42, %43 : vector<16x32xf32>
    %45 = vector.extract_strided_slice %39 {offsets = [48, 0], sizes = [16, 32], strides = [1, 1]} : vector<64x32xf32> to vector<16x32xf32>
    %46 = arith.addf %44, %45 : vector<16x32xf32>
    %c304 = arith.constant 304 : index
    %c0_10 = arith.constant 0 : index
    %47 = vector.load %arg1[%c304, %c0_10] : memref<320x128xbf16, #tpu.memory_space<vmem>>, vector<3x128xbf16>
    %48 = arith.extf %47 : vector<3x128xbf16> to vector<3x128xf32>
    %49 = vector.extract_strided_slice %48 {offsets = [0, 0], sizes = [1, 32], strides = [1, 1]} : vector<3x128xf32> to vector<1x32xf32>
    %50 = vector.extract_strided_slice %48 {offsets = [0, 32], sizes = [1, 32], strides = [1, 1]} : vector<3x128xf32> to vector<1x32xf32>
    %51 = vector.extract_strided_slice %48 {offsets = [0, 64], sizes = [1, 32], strides = [1, 1]} : vector<3x128xf32> to vector<1x32xf32>
    %52 = vector.extract_strided_slice %48 {offsets = [0, 96], sizes = [1, 32], strides = [1, 1]} : vector<3x128xf32> to vector<1x32xf32>
    %53 = vector.extract_strided_slice %48 {offsets = [1, 0], sizes = [1, 32], strides = [1, 1]} : vector<3x128xf32> to vector<1x32xf32>
    %54 = vector.extract_strided_slice %48 {offsets = [1, 32], sizes = [1, 32], strides = [1, 1]} : vector<3x128xf32> to vector<1x32xf32>
    %55 = vector.extract_strided_slice %48 {offsets = [2, 0], sizes = [1, 128], strides = [1, 1]} : vector<3x128xf32> to vector<1x128xf32>
    %c208 = arith.constant 208 : index
    %c0_11 = arith.constant 0 : index
    %56 = vector.load %arg1[%c208, %c0_11] : memref<320x128xbf16, #tpu.memory_space<vmem>>, vector<32x32xbf16>
    %57 = arith.truncf %46 : vector<16x32xf32> to vector<16x32xbf16>
    %cst_12 = arith.constant dense<0.000000e+00> : vector<16x32xf32>
    %58 = tpu.matmul %57, %56, %cst_12 {dimension_numbers = #tpu.dot_dimension_numbers<[1], [0], [0], [1], [0, 0, 1, 1], [], []>} : vector<16x32xbf16>, vector<32x32xbf16>, vector<16x32xf32> -> vector<16x32xf32>
    %59 = vector.broadcast %49 : vector<1x32xf32> to vector<16x32xf32>
    %60 = arith.addf %58, %59 : vector<16x32xf32>
    %61 = arith.addf %12, %60 : vector<16x32xf32>
    %cst_13 = arith.constant dense<0.000000e+00> : vector<16xf32>
    %62 = vector.multi_reduction <add>, %61, %cst_13 [1] : vector<16x32xf32> to vector<16xf32>
    %63 = vector.shape_cast %62 : vector<16xf32> to vector<16x1xf32>
    %cst_14 = arith.constant 3.200000e+01 : f32
    %64 = vector.broadcast %cst_14 : f32 to vector<16x1xf32>
    %65 = arith.divf %63, %64 : vector<16x1xf32>
    %66 = vector.broadcast %65 : vector<16x1xf32> to vector<16x32xf32>
    %67 = arith.subf %61, %66 : vector<16x32xf32>
    %68 = arith.mulf %67, %67 : vector<16x32xf32>
    %cst_15 = arith.constant dense<0.000000e+00> : vector<16xf32>
    %69 = vector.multi_reduction <add>, %68, %cst_15 [1] : vector<16x32xf32> to vector<16xf32>
    %70 = vector.shape_cast %69 : vector<16xf32> to vector<16x1xf32>
    %cst_16 = arith.constant 3.200000e+01 : f32
    %71 = vector.broadcast %cst_16 : f32 to vector<16x1xf32>
    %72 = arith.divf %70, %71 : vector<16x1xf32>
    %73 = vector.broadcast %65 : vector<16x1xf32> to vector<16x32xf32>
    %74 = arith.subf %61, %73 : vector<16x32xf32>
    %cst_17 = arith.constant 9.99999974E-6 : f32
    %75 = vector.broadcast %cst_17 : f32 to vector<16x1xf32>
    %76 = arith.addf %72, %75 : vector<16x1xf32>
    %77 = math.rsqrt %76 : vector<16x1xf32>
    %78 = vector.broadcast %77 : vector<16x1xf32> to vector<16x32xf32>
    %79 = arith.mulf %74, %78 : vector<16x32xf32>
    %80 = vector.broadcast %50 : vector<1x32xf32> to vector<16x32xf32>
    %81 = arith.mulf %79, %80 : vector<16x32xf32>
    %82 = vector.broadcast %51 : vector<1x32xf32> to vector<16x32xf32>
    %83 = arith.addf %81, %82 : vector<16x32xf32>
    %c240 = arith.constant 240 : index
    %c0_18 = arith.constant 0 : index
    %84 = vector.load %arg1[%c240, %c0_18] : memref<320x128xbf16, #tpu.memory_space<vmem>>, vector<32x32xbf16>
    %85 = arith.truncf %83 : vector<16x32xf32> to vector<16x32xbf16>
    %cst_19 = arith.constant dense<0.000000e+00> : vector<16x32xf32>
    %86 = tpu.matmul %85, %84, %cst_19 {dimension_numbers = #tpu.dot_dimension_numbers<[1], [0], [0], [1], [0, 0, 1, 1], [], []>} : vector<16x32xbf16>, vector<32x32xbf16>, vector<16x32xf32> -> vector<16x32xf32>
    %87 = vector.broadcast %52 : vector<1x32xf32> to vector<16x32xf32>
    %88 = arith.addf %86, %87 : vector<16x32xf32>
    %cst_20 = arith.constant 0.000000e+00 : f32
    %89 = vector.broadcast %cst_20 : f32 to vector<16x32xf32>
    %90 = arith.maximumf %88, %89 : vector<16x32xf32>
    %91 = arith.addf %83, %90 : vector<16x32xf32>
    %cst_21 = arith.constant dense<0.000000e+00> : vector<16xf32>
    %92 = vector.multi_reduction <add>, %91, %cst_21 [1] : vector<16x32xf32> to vector<16xf32>
    %93 = vector.shape_cast %92 : vector<16xf32> to vector<16x1xf32>
    %cst_22 = arith.constant 3.200000e+01 : f32
    %94 = vector.broadcast %cst_22 : f32 to vector<16x1xf32>
    %95 = arith.divf %93, %94 : vector<16x1xf32>
    %96 = vector.broadcast %95 : vector<16x1xf32> to vector<16x32xf32>
    %97 = arith.subf %91, %96 : vector<16x32xf32>
    %98 = arith.mulf %97, %97 : vector<16x32xf32>
    %cst_23 = arith.constant dense<0.000000e+00> : vector<16xf32>
    %99 = vector.multi_reduction <add>, %98, %cst_23 [1] : vector<16x32xf32> to vector<16xf32>
    %100 = vector.shape_cast %99 : vector<16xf32> to vector<16x1xf32>
    %cst_24 = arith.constant 3.200000e+01 : f32
    %101 = vector.broadcast %cst_24 : f32 to vector<16x1xf32>
    %102 = arith.divf %100, %101 : vector<16x1xf32>
    %103 = vector.broadcast %95 : vector<16x1xf32> to vector<16x32xf32>
    %104 = arith.subf %91, %103 : vector<16x32xf32>
    %cst_25 = arith.constant 9.99999974E-6 : f32
    %105 = vector.broadcast %cst_25 : f32 to vector<16x1xf32>
    %106 = arith.addf %102, %105 : vector<16x1xf32>
    %107 = math.rsqrt %106 : vector<16x1xf32>
    %108 = vector.broadcast %107 : vector<16x1xf32> to vector<16x32xf32>
    %109 = arith.mulf %104, %108 : vector<16x32xf32>
    %110 = vector.broadcast %53 : vector<1x32xf32> to vector<16x32xf32>
    %111 = arith.mulf %109, %110 : vector<16x32xf32>
    %112 = vector.broadcast %54 : vector<1x32xf32> to vector<16x32xf32>
    %113 = arith.addf %111, %112 : vector<16x32xf32>
    %c272 = arith.constant 272 : index
    %c0_26 = arith.constant 0 : index
    %114 = vector.load %arg1[%c272, %c0_26] : memref<320x128xbf16, #tpu.memory_space<vmem>>, vector<32x128xbf16>
    %115 = arith.truncf %113 : vector<16x32xf32> to vector<16x32xbf16>
    %cst_27 = arith.constant dense<0.000000e+00> : vector<16x128xf32>
    %116 = tpu.matmul %115, %114, %cst_27 {dimension_numbers = #tpu.dot_dimension_numbers<[1], [0], [0], [1], [0, 0, 1, 1], [], []>} : vector<16x32xbf16>, vector<32x128xbf16>, vector<16x128xf32> -> vector<16x128xf32>
    %117 = vector.broadcast %55 : vector<1x128xf32> to vector<16x128xf32>
    %118 = arith.addf %116, %117 : vector<16x128xf32>
    %c0_28 = arith.constant 0 : index
    %c0_29 = arith.constant 0 : index
    %119 = vector.load %arg2[%c0_28, %c0_29] : memref<16x128xf32, #tpu.memory_space<vmem>>, vector<16x128xf32>
    tpu.vector_store %arg2[%c0_28, %c0_29], %118 {strides = array<i32>} : memref<16x128xf32, #tpu.memory_space<vmem>>, vector<16x128xf32>,
    return
  }
}

</mosaic_0001>

<bundles_post_ra>
// kernel: tpu_custom_call.1
= control target key start
LH: loop header
LB: loop body
LE: loop exit
PB: predicated region body
PF: predicated region fallthrough
CT: control target
= control target key end

     0   :  { %7 = vsyncpa [#allocation3], 0  ;;  %s1271_s0 = inlined_call_operand.vmem [shape: s32[16,1], index: 0, kind: input, shape index: {}]   ;;  %s1272_s1 = inlined_call_operand.hbm [shape: bf16[320,128], index: 1, kind: input, shape index: {}]   ;;  %s1273_s2 = inlined_call_operand.hbm [shape: f32[16,128], index: 2, kind: output, shape index: {}]  }
   0x1   :  { %8 = vsyncpa [#allocation4], 0  ;;  %s1062_s9 = smov [#allocation2]   ;;  %s1014_s13 = scalar_lea.hbm %s1272_s1, 2560 }
   0x2   :  { %s16_s10 = sshll.u32 %s1062_s9, 4  ;;  %p1015_p0 = scmp.ne.s32.totalorder %s1272_s1, %s1014_s13  ;;  %s17_s10 = int_to_ptr.vmem [resolvable:$true] %s16_s10 }
   0x3   :  { %p1018_p1 = scmp.lt.u32.totalorder %s1014_s13, %s1272_s1 }
   0x5   :  { %p1020_p2 = pnand %p1018_p1, %p1015_p0 }
   0x7   :  { %1023 = shalt.err (!%p1020_p2)
}
   0x8   :  { %s1024_s18 = scalar_lea.vmem %s17_s10, 2560  ;;  %p1029_p4 = scmp.lt.s32.totalorder %s17_s10, %s17_s10 }
   0x9   :  { %p1025_p3 = scmp.ne.s32.totalorder %s17_s10, %s1024_s18  ;;  %p1030_p5 = scmp.lt.s32.totalorder %s1024_s18, %s1024_s18 }
   0xb   :  { %p1031_p6 = por %p1030_p5, %p1029_p4 }
   0xd   :  { %p1032_p7 = pnand %p1031_p6, %p1025_p3 }
   0xf   :  { %1035 = shalt.err (!%p1032_p7)
}
  0x10   :  { %s1063_s19 = smov 64   ;;  %s1064_s20 = smov 4  }
  0x11   :  { %22 = dma.hbm_to_vmem [thread:$0]  %s1272_s1, 2560, %s17_s10, [#allocation3], %s1063_s19, %s1063_s19, %s1064_s20  }
  0x12   :  { %1058 = dma.done.wait [#allocation3], 2560  }
  0x13   :  { %1059 = vsyncadd [#allocation3], 4294964736  ;;  %v1065_v0 = vmov 0   ;;  %v1066_v1 = vmov 0.0   ;;  %v27_v2 = vld [vmem:[%s1271_s0] sm:$0xff]  ;;  %v28_v4 = vld [vmem:[%s1271_s0 + $0x8] sm:$0xff]  ;;  %v29_v24 = vlaneseq }
  0x14   :  { %943 = vset.pattern.permute.xlu0 %v1065_v0  ;;  %875 = vmatprep.subr.bf16.mxu0 %v1066_v1  ;;  %v964_v3 = vld [vmem:[#allocation2] sm:$0xff]   ;;  %v965_v5 = vld [vmem:[#allocation2 + $0x8] sm:$0xff]   ;;  %v966_v6 = vld [vmem:[#allocation2 + $0x10] sm:$0xff]   ;;  %vm1067_vm0 = vmmov 0   ;;  %s1068_s0 = smov 32   ;;  %vm80_vm3 = vcmask 523264  }
  0x15   :  { %32 = vperm.xlu0 %943, %v27_v2   ;;  %876 = vmatpush3.bf16.msra.mxu0 %v964_v3  ;;  %v1113_v7 = vld [vmem:[#allocation2 + $0x28] sm:$0xff]   ;;  %v1115_v8 = vld [vmem:[#allocation2 + $0x30] sm:$0xff]   ;;  %v1121_v13 = vld [vmem:[#allocation2 + $0x38] sm:$0xff]   ;;  %v30_v25 = vand.u32 127, %v29_v24  ;;  %s1069_s1 = smov 96   ;;  %vm217_vm4 = vcmask 261120  }
  0x16   :  { %877 = vmatprep.subr.bf16.mxu0 %v1066_v1  ;;  %883 = vmatprep.mubr.msk.bf16.mxu0 %vm1067_vm0, %v1066_v1  ;;  %v812_v9 = vunpack.c.l.bf16 %v1113_v7  ;;  %v813_v10 = vunpack.c.h.bf16 %v1113_v7  ;;  %v816_v11 = vunpack.c.l.bf16 %v1115_v8  ;;  %v817_v12 = vunpack.c.h.bf16 %v1115_v8  ;;  %v967_v14 = vld [vmem:[#allocation2 + $0x18] sm:$0xff]   ;;  %v1123_v15 = vld [vmem:[#allocation2 + $0x40] sm:$0xff]   ;;  %s1070_s27 = smov [#allocation5]  }
  0x17   :  { %v820_v16 = vunpack.c.l.bf16 %v1121_v13  ;;  %v821_v17 = vunpack.c.h.bf16 %v1121_v13  ;;  %v824_v21 = vunpack.c.l.bf16 %v1123_v15  ;;  %v825_v22 = vunpack.c.h.bf16 %v1123_v15  ;;  %v842_v32 = vld [vmem:[#allocation2 + $0x20] sm:$0xff]   ;;  %s770_s28 = sshll.u32 %s1070_s27, 4  ;;  %s771_s28 = int_to_ptr.vmem [resolvable:$true] %s770_s28 }
  0x18   :  { %v944_v18 = vpack.i.bf16 %v813_v10, %v812_v9  ;;  %v949_v20 = vpack.i.bf16 %v817_v12, %v816_v11  ;;  %v808_v34 = vunpack.c.l.bf16 %v842_v32  ;;  %v809_v35 = vunpack.c.h.bf16 %v842_v32  ;;  %v849_v32 = vld [vmem:[#allocation2 + $0x58] sm:$0xff]   ;;  %s1036_s29 = scalar_lea.vmem %s771_s28, 256  ;;  %p1041_p9 = scmp.lt.s32.totalorder %s771_s28, %s771_s28 }
  0x19   :  { %35 = vperm.xlu0 %943, %v28_v4   ;;  %878 = vmatpush3.bf16.msra.mxu0 %v965_v5  ;;  %v954_v19 = vpack.i.bf16 %v821_v17, %v820_v16  ;;  %v959_v23 = vpack.i.bf16 %v825_v22, %v824_v21  ;;  %vm298_vm5 = vcmask 130048   ;;  %p1037_p8 = scmp.ne.s32.totalorder %s771_s28, %s1036_s29  ;;  %p1042_p10 = scmp.lt.s32.totalorder %s1036_s29, %s1036_s29 }
  0x1a   :  { %879 = vmatprep.subr.bf16.mxu0 %v1066_v1  ;;  %945 = vrot.lane.b32.xlu1 %v944_v18, %s1068_s0  ;;  %v847_v18 = vld [vmem:[#allocation2 + $0x48] sm:$0xff]  }
  0x1b   :  { %p1043_p11 = por %p1042_p10, %p1041_p9 }
  0x1d   :  { %880 = vmatpush3.bf16.msra.mxu0 %v966_v6  ;;  %955 = vrot.lane.b32.xlu0 %v954_v19, %s1068_s0  ;;  %v828_v19 = vunpack.c.l.bf16 %v847_v18  ;;  %p1044_p12 = pnand %p1043_p11, %p1037_p8 }
  0x1e   :  { %881 = vmatprep.subr.bf16.mxu0 %v1066_v1  ;;  %950 = vrot.lane.b32.xlu1 %v949_v20, %s1068_s0  ;;  %v848_v20 = vld [vmem:[#allocation2 + $0x50] sm:$0xff]  }
  0x21   :  { %882 = vmatpush3.bf16.msra.mxu0 %v967_v14 }
  0x22   :  { %960 = vrot.lane.b32.xlu1 %v959_v23, %s1068_s0 }
  0x8c   :  { %v946_v31 = vpop.permute.xlu1 %945 }
  0x8d   :  { %v948_v37 = vunpack.i.h.bf16 %v946_v31  ;;  %v947_v38 = vunpack.i.l.bf16 %v946_v31 }
  0x90   :  { %v951_v33 = vpop.permute.xlu1 %950 }
  0x91   :  { %v953_v39 = vunpack.i.h.bf16 %v951_v33  ;;  %v952_v44 = vunpack.i.l.bf16 %v951_v33 }
  0x94   :  { %v33_v26 = vpop.permute.xlu0 %32  ;;  %v961_v45 = vpop.permute.xlu1 %960 }
  0x95   :  { %vm37_vm1 = vcmp.eq.s32.totalorder %v30_v25, %v33_v26  ;;  %v963_v49 = vunpack.i.h.bf16 %v961_v45  ;;  %v962_v55 = vunpack.i.l.bf16 %v961_v45  ;;  %v829_v26 = vunpack.c.h.bf16 %v847_v18 }
  0x96   :  { %v782_v28 = vsel %vm37_vm1, 1.0, %v1066_v1 }
  0x98   :  { %v36_v27 = vpop.permute.xlu0 %35 }
  0x99   :  { %vm38_vm2 = vcmp.eq.s32.totalorder %v30_v25, %v36_v27  ;;  %v833_v25 = vunpack.c.h.bf16 %v848_v20 }
  0x9a   :  { %v783_v29 = vsel %vm38_vm2, 1.0, %v1066_v1 }
  0x9b   :  { %v43_v30 = vpack.c.bf16 %v783_v29, %v782_v28  ;;  %v832_v28 = vunpack.c.l.bf16 %v848_v20 }
  0x9c   :  { %v956_v41 = vpop.permute.xlu0 %955 }
  0x9d   :  { %884 = vmatmul.mubr.msk.bf16.vlgmr.msra.gmra.mrb[0].mxu0 %vm80_vm3, %v43_v30  ;;  %v958_v46 = vunpack.i.h.bf16 %v956_v41  ;;  %v957_v50 = vunpack.i.l.bf16 %v956_v41 }
 0x170   :  { %v118_v36 = vpop.f32.mrb[0].mxu0 }
 0x171   :  { %v1153_v40 = vadd.f32 %v808_v34, %v118_v36  ;;  %v885_v42 = vpop.f32.mrb[1].mxu0 }
 0x172   :  { %v121_v43 = vpop.f32.mrb[2].mxu0 }
 0x173   :  { %v1155_v47 = vadd.f32 %v809_v35, %v121_v43  ;;  %v886_v48 = vpop.f32.mrb[3].mxu0  ;;  %v189_v52 = vmul.f32 %v947_v38, %v1153_v40  ;;  %v191_v57 = vmul.f32 %v952_v44, %v1153_v40  ;;  %v193_v59 = vmul.f32 %v957_v50, %v1153_v40 }
 0x174   :  { %v195_v63 = vmul.f32 %v962_v55, %v1153_v40  ;;  %v836_v38 = vunpack.c.l.bf16 %v849_v32  ;;  %v837_v43 = vunpack.c.h.bf16 %v849_v32 }
 0x175   :  { %v1159_v51 = vpack.c.bf16 %v1155_v47, %v1153_v40  ;;  %v190_v53 = vmul.f32 %v948_v37, %v1155_v47  ;;  %v192_v54 = vmul.f32 %v953_v39, %v1155_v47  ;;  %v194_v58 = vmul.f32 %v958_v46, %v1155_v47  ;;  %v850_v39 = vld [vmem:[#allocation2 + $0x60] sm:$0xff]  }
 0x176   :  { %v196_v61 = vmul.f32 %v963_v49, %v1155_v47  ;;  %v840_v45 = vunpack.c.l.bf16 %v850_v39  ;;  %v841_v48 = vunpack.c.h.bf16 %v850_v39 }
 0x177   :  { %215 = vrot.lane.b32.xlu0 %v1159_v51, %s1063_s19  ;;  %v197_v56 = vpack.c.bf16 %v190_v53, %v189_v52  ;;  %v198_v60 = vpack.c.bf16 %v192_v54, %v191_v57  ;;  %v199_v62 = vpack.c.bf16 %v194_v58, %v193_v59 }
 0x178   :  { %v200_v0 = vpack.c.bf16 %v196_v61, %v195_v63 }
 0x179   :  { %206 = vrot.lane.b32.xlu1 %v197_v56, %s1069_s1 }
 0x17b   :  { %208 = vrot.lane.b32.xlu0 %v198_v60, %s1069_s1 }
 0x17d   :  { %210 = vrot.lane.b32.xlu1 %v199_v62, %s1069_s1 }
 0x17f   :  { %212 = vrot.lane.b32.xlu0 %v200_v0, %s1069_s1 }
 0x1e9   :  { %v216_v2 = vpop.permute.xlu0 %215 }
 0x1ea   :  { %931 = vmatprep.subr.msk.bf16.mxu1 %vm217_vm4, %v216_v2  ;;  %v231_v3 = vsel %vm217_vm4, %v216_v2, 0 }
 0x1eb   :  { %v207_v4 = vpop.permute.xlu1 %206  ;;  %888 = vmatpush3.bf16.xpose.msra.mxu1 %v231_v3 }
 0x1ec   :  { %889 = vmatprep.mubr.msk.bf16.mxu1 %vm217_vm4, %v207_v4  ;;  %907 = vmatprep.subr.bf16.mxu1 %v1066_v1 }
 0x1ed   :  { %v209_v5 = vpop.permute.xlu0 %208 }
 0x1ef   :  { %v211_v6 = vpop.permute.xlu1 %210 }
 0x1f1   :  { %v213_v14 = vpop.permute.xlu0 %212 }
 0x1f2   :  { %890 = vmatmul.mubr.msk.bf16.vlgmr.msra.gmra.mrb[0].mxu1 %vm217_vm4, %v209_v5 }
 0x1f3   :  { %893 = vmatprep.mubr.msk.bf16.mxu1 %vm217_vm4, %v211_v6 }
 0x1fa   :  { %894 = vmatmul.mubr.msk.bf16.gmra.mrb[4].mxu1 %vm217_vm4, %v213_v14 }
 0x1fb   :  { %911 = vmatprep.mubr.msk.bf16.mxu1 %vm1067_vm0, %v1066_v1 }
 0x2c5   :  { %v891_v23 = vpop.f32.mrb[0].mxu1 }
 0x2c6   :  { %v267_v27 = vpop.f32.mrb[1].mxu1  ;;  %v276_v36 = vadd.f32 %v891_v23, %v832_v28 }
 0x2c7   :  { %v268_v29 = vadd.f32 %v828_v19, %v267_v27  ;;  %v892_v30 = vpop.f32.mrb[2].mxu1 }
 0x2c8   :  { %v270_v31 = vpop.f32.mrb[3].mxu1  ;;  %v279_v33 = vadd.f32 %v892_v30, %v833_v25  ;;  %v305_v50 = vsel %vm298_vm5, %v276_v36, -inf }
 0x2c9   :  { %v271_v34 = vadd.f32 %v829_v26, %v270_v31  ;;  %v299_v35 = vsel %vm298_vm5, %v268_v29, -inf }
 0x2ca   :  { %300 = vmax.xlane.f32.xlu1 %v299_v35  ;;  %v308_v42 = vsel %vm298_vm5, %v279_v33, -inf }
 0x2cb   :  { %v302_v37 = vsel %vm298_vm5, %v271_v34, -inf }
 0x2cc   :  { %303 = vmax.xlane.f32.xlu0 %v302_v37 }
 0x2cd   :  { %v895_v41 = vpop.f32.mrb[4].mxu1 }
 0x2ce   :  { %309 = vmax.xlane.f32.xlu1 %v308_v42  ;;  %v283_v44 = vpop.f32.mrb[5].mxu1  ;;  %v292_v54 = vadd.f32 %v895_v41, %v840_v45 }
 0x2cf   :  { %v284_v46 = vadd.f32 %v836_v38, %v283_v44  ;;  %v896_v49 = vpop.f32.mrb[6].mxu1 }
 0x2d0   :  { %306 = vmax.xlane.f32.xlu0 %v305_v50  ;;  %v286_v52 = vpop.f32.mrb[7].mxu1  ;;  %v295_v55 = vadd.f32 %v896_v49, %v841_v48  ;;  %v317_v59 = vsel %vm298_vm5, %v292_v54, -inf }
 0x2d1   :  { %v287_v53 = vadd.f32 %v837_v43, %v286_v52  ;;  %v311_v57 = vsel %vm298_vm5, %v284_v46, -inf }
 0x2d2   :  { %v320_v58 = vsel %vm298_vm5, %v295_v55, -inf }
 0x2d3   :  { %v314_v56 = vsel %vm298_vm5, %v287_v53, -inf }
 0x2d4   :  { %315 = vmax.xlane.f32.xlu1 %v314_v56  ;;  %312 = vmax.xlane.f32.xlu0 %v311_v57 }
 0x2d8   :  { %321 = vmax.xlane.f32.xlu1 %v320_v58  ;;  %318 = vmax.xlane.f32.xlu0 %v317_v59 }
 0x357   :  { %v301_v60 = vpop.xlane.xlu1 %300 }
 0x358   :  { %v323_v0 = vsub.f32 %v268_v29, %v301_v60 }
 0x359   :  { %v304_v61 = vpop.xlane.xlu0 %303 }
 0x35a   :  { %v324_v62 = vsub.f32 %v271_v34, %v304_v61  ;;  %v331_v14 = vmul.f32 1.442695, %v323_v0 }
 0x35b   :  { %v310_v63 = vpop.xlane.xlu1 %309 }
 0x35c   :  { %v333_v2 = vmul.f32 1.442695, %v324_v62  ;;  %v326_v3 = vsub.f32 %v279_v33, %v310_v63 }
 0x35d   :  { %v307_v4 = vpop.xlane.xlu0 %306 }
 0x35e   :  { %974 = vpow2.f32 %v333_v2  ;;  %v337_v5 = vmul.f32 1.442695, %v326_v3  ;;  %v325_v6 = vsub.f32 %v276_v36, %v307_v4 }
 0x360   :  { %976 = vpow2.f32 %v337_v5  ;;  %v335_v18 = vmul.f32 1.442695, %v325_v6 }
 0x361   :  { %v313_v19 = vpop.xlane.xlu0 %312  ;;  %v316_v20 = vpop.xlane.xlu1 %315 }
 0x362   :  { %978 = vpow2.f32 %v335_v18  ;;  %v328_v23 = vsub.f32 %v287_v53, %v316_v20  ;;  %v327_v25 = vsub.f32 %v284_v46, %v313_v19 }
 0x363   :  { %980 = vpow2.f32 %v331_v14 }
 0x364   :  { %v341_v26 = vmul.f32 1.442695, %v328_v23  ;;  %v339_v32 = vmul.f32 1.442695, %v327_v25 }
 0x365   :  { %v319_v27 = vpop.xlane.xlu0 %318  ;;  %v322_v28 = vpop.xlane.xlu1 %321 }
 0x366   :  { %v329_v30 = vsub.f32 %v292_v54, %v319_v27  ;;  %v330_v29 = vsub.f32 %v295_v55, %v322_v28  ;;  %982 = vpow2.f32 %v341_v26 }
 0x368   :  { %v975_v31 = vpop.eup %974  ;;  %v343_v33 = vmul.f32 1.442695, %v329_v30  ;;  %v345_v34 = vmul.f32 1.442695, %v330_v29 }
 0x369   :  { %v350_v35 = vsel %vm298_vm5, %v975_v31, 0.0 }
 0x36a   :  { %v977_v36 = vpop.eup %976  ;;  %984 = vpow2.f32 %v343_v33  ;;  %351 = vadd.xlane.f32.xlu1 %v350_v35  ;;  %v969_v33 = vld [vmem:[#allocation2 + $0x70] sm:$0xff]   ;;  %v485_v35 = vld [vmem:[#allocation2 + $0x98] sm:$0x3] }
 0x36b   :  { %986 = vpow2.f32 %v345_v34  ;;  %v356_v39 = vsel %vm298_vm5, %v977_v36, 0.0 }
 0x36c   :  { %v979_v37 = vpop.eup %978  ;;  %988 = vpow2.f32 %v339_v32  ;;  %v1210_v32 = vshrl.u32 %v29_v24, 7 }
 0x36d   :  { %v353_v38 = vsel %vm298_vm5, %v979_v37, 0.0  ;;  %v981_v41 = vpop.eup %980 }
 0x36e   :  { %354 = vadd.xlane.f32.xlu0 %v353_v38  ;;  %357 = vadd.xlane.f32.xlu1 %v356_v39  ;;  %v347_v43 = vsel %vm298_vm5, %v981_v41, 0.0  ;;  %v494_v34 = vsub.s32 0, %v1210_v32 }
 0x370   :  { %v983_v42 = vpop.eup %982 }
 0x371   :  { %v362_v44 = vsel %vm298_vm5, %v983_v42, 0.0 }
 0x372   :  { %348 = vadd.xlane.f32.xlu0 %v347_v43  ;;  %363 = vadd.xlane.f32.xlu1 %v362_v44 }
 0x374   :  { %v985_v45 = vpop.eup %984 }
 0x375   :  { %v987_v46 = vpop.eup %986  ;;  %v365_v48 = vsel %vm298_vm5, %v985_v45, 0.0 }
 0x376   :  { %v989_v49 = vpop.eup %988  ;;  %366 = vadd.xlane.f32.xlu0 %v365_v48  ;;  %v368_v50 = vsel %vm298_vm5, %v987_v46, 0.0 }
 0x377   :  { %369 = vadd.xlane.f32.xlu1 %v368_v50  ;;  %v359_v52 = vsel %vm298_vm5, %v989_v49, 0.0 }
 0x37a   :  { %360 = vadd.xlane.f32.xlu0 %v359_v52 }
 0x390   :  { %391 = vrot.lane.b32.xlu0 %v1159_v51, %s1068_s0 }
 0x3f7   :  { %v352_v53 = vpop.xlane.xlu1 %351 }
 0x3fb   :  { %v355_v54 = vpop.xlane.xlu0 %354  ;;  %v358_v55 = vpop.xlane.xlu1 %357 }
 0x3fc   :  { %990 = vrcp.f32 %v355_v54 }
 0x3fd   :  { %992 = vrcp.f32 %v358_v55 }
 0x3fe   :  { %994 = vrcp.f32 %v352_v53 }
 0x3ff   :  { %v349_v56 = vpop.xlane.xlu0 %348  ;;  %v364_v57 = vpop.xlane.xlu1 %363 }
 0x400   :  { %996 = vrcp.f32 %v349_v56 }
 0x403   :  { %v367_v58 = vpop.xlane.xlu0 %366 }
 0x404   :  { %998 = vrcp.f32 %v367_v58  ;;  %v370_v59 = vpop.xlane.xlu1 %369 }
 0x405   :  { %1000 = vrcp.f32 %v370_v59 }
 0x406   :  { %v991_v60 = vpop.eup %990  ;;  %1002 = vrcp.f32 %v364_v57 }
 0x407   :  { %v993_v61 = vpop.eup %992  ;;  %v361_v62 = vpop.xlane.xlu0 %360  ;;  %v381_v0 = vmul.f32 %v991_v60, %v979_v37 }
 0x408   :  { %v995_v63 = vpop.eup %994  ;;  %1004 = vrcp.f32 %v361_v62  ;;  %v382_v2 = vmul.f32 %v993_v61, %v977_v36  ;;  %v1215_v36 = vunpack.c.l.bf16 %v485_v35 }
 0x409   :  { %v380_v5 = vmul.f32 %v995_v63, %v975_v31  ;;  %v968_v31 = vld [vmem:[#allocation2 + $0x68] sm:$0xff]  }
 0x40a   :  { %v997_v51 = vpop.eup %996  ;;  %v388_v18 = vpack.c.bf16 %v382_v2, %v381_v0  ;;  %908 = vmatpush3.bf16.msra.mxu1 %v968_v31  ;;  %v495_v37 = vrot.slane %v1215_v36, %v494_v34 }
 0x40b   :  { %v392_v3 = vpop.permute.xlu0 %391  ;;  %v379_v4 = vmul.f32 %v997_v51, %v981_v41  ;;  %909 = vmatprep.subr.bf16.mxu1 %v1066_v1 }
 0x40c   :  { %897 = vmatprep.subr.bf16.mxu0 %v392_v3  ;;  %587 = vrot.lane.b32.xlu0 %v495_v37, %s1063_s19 }
 0x40d   :  { %898 = vmatpush3.bf16.msra.mxu0 %v392_v3  ;;  %v387_v6 = vpack.c.bf16 %v380_v5, %v379_v4 }
 0x40e   :  { %v999_v14 = vpop.eup %998  ;;  %923 = vmatprep.subr.bf16.mxu0 %v1066_v1  ;;  %910 = vmatpush3.bf16.msra.mxu1 %v969_v33 }
 0x40f   :  { %v1001_v19 = vpop.eup %1000  ;;  %899 = vmatprep.mubr.msk.bf16.mxu0 %vm298_vm5, %v387_v6  ;;  %v385_v25 = vmul.f32 %v999_v14, %v985_v45  ;;  %915 = vmatprep.subr.bf16.mxu1 %v1066_v1  ;;  %v971_v6 = vld [vmem:[#allocation2 + $0x80] sm:$0xff]  }
 0x410   :  { %v1003_v20 = vpop.eup %1002  ;;  %900 = vmatmul.mubr.msk.bf16.vlgmr.msra.gmra.mrb[4].mxu0 %vm298_vm5, %v388_v18  ;;  %v386_v26 = vmul.f32 %v1001_v19, %v987_v46  ;;  %609 = vrot.lane.b32.xlu0 %v495_v37, %s1068_s0 }
 0x411   :  { %v384_v28 = vmul.f32 %v1003_v20, %v983_v42 }
 0x412   :  { %v1005_v23 = vpop.eup %1004  ;;  %v390_v29 = vpack.c.bf16 %v386_v26, %v385_v25 }
 0x413   :  { %v383_v27 = vmul.f32 %v1005_v23, %v989_v49 }
 0x415   :  { %v389_v30 = vpack.c.bf16 %v384_v28, %v383_v27 }
 0x417   :  { %903 = vmatprep.mubr.msk.bf16.mxu0 %vm298_vm5, %v389_v30 }
 0x418   :  { %904 = vmatmul.mubr.msk.bf16.gmra.mrb[8].mxu0 %vm298_vm5, %v390_v29 }
 0x419   :  { %927 = vmatprep.mubr.msk.bf16.mxu0 %vm1067_vm0, %v1066_v1 }
 0x47e   :  { %v588_v33 = vpop.permute.xlu0 %587 }
 0x4e3   :  { %v901_v38 = vpop.f32.mrb[4].mxu0 }
 0x4e4   :  { %v473_v24 = vmul.f32 %v901_v38, %v816_v11  ;;  %v440_v39 = vpop.f32.mrb[5].mxu0 }
 0x4e5   :  { %v471_v41 = vmul.f32 %v812_v9, %v440_v39  ;;  %v902_v42 = vpop.f32.mrb[6].mxu0 }
 0x4e6   :  { %v474_v43 = vmul.f32 %v902_v42, %v817_v12  ;;  %v443_v44 = vpop.f32.mrb[7].mxu0 }
 0x4e7   :  { %v479_v45 = vadd.f32 %v473_v24, %v471_v41  ;;  %v472_v46 = vmul.f32 %v813_v10, %v443_v44  ;;  %v610_v24 = vpop.permute.xlu0 %609 }
 0x4e9   :  { %v480_v48 = vadd.f32 %v474_v43, %v472_v46 }
 0x4eb   :  { %v905_v49 = vpop.f32.mrb[8].mxu0 }
 0x4ec   :  { %v456_v50 = vpop.f32.mrb[9].mxu0  ;;  %v477_v9 = vmul.f32 %v905_v49, %v824_v21 }
 0x4ed   :  { %v475_v52 = vmul.f32 %v820_v16, %v456_v50  ;;  %v906_v11 = vpop.f32.mrb[10].mxu0 }
 0x4ee   :  { %v459_v53 = vpop.f32.mrb[11].mxu0  ;;  %v478_v7 = vmul.f32 %v906_v11, %v825_v22 }
 0x4ef   :  { %v481_v54 = vadd.f32 %v479_v45, %v475_v52  ;;  %v476_v8 = vmul.f32 %v821_v17, %v459_v53 }
 0x4f1   :  { %v483_v12 = vadd.f32 %v481_v54, %v477_v9  ;;  %v482_v10 = vadd.f32 %v480_v48, %v476_v8 }
 0x4f3   :  { %v484_v55 = vadd.f32 %v482_v10, %v478_v7 }
 0x4f5   :  { %v491_v56 = vpack.c.bf16 %v484_v55, %v483_v12 }
 0x4f7   :  { %912 = vmatmul.mubr.msk.bf16.vlgmr.msra.gmra.mrb[8].mxu1 %vm217_vm4, %v491_v56 }
 0x4f8   :  { %919 = vmatprep.mubr.msk.bf16.mxu1 %vm1067_vm0, %v1066_v1 }
 0x5ca   :  { %v545_v16 = vpop.f32.mrb[8].mxu1 }
 0x5cb   :  { %v546_v57 = vadd.f32 %v545_v16, %v495_v37  ;;  %v913_v58 = vpop.f32.mrb[9].mxu1 }
 0x5cc   :  { %v548_v21 = vpop.f32.mrb[10].mxu1 }
 0x5cd   :  { %v549_v59 = vadd.f32 %v548_v21, %v495_v37  ;;  %v914_v60 = vpop.f32.mrb[11].mxu1  ;;  %v552_v13 = vadd.f32 %v546_v57, %v1153_v40  ;;  %v688_v57 = vsub.s32 1, %v1210_v32  ;;  %v972_v21 = vld [vmem:[#allocation2 + $0x88] sm:$0xff]  }
 0x5ce   :  { %924 = vmatpush3.bf16.msra.mxu0 %v972_v21 }
 0x5cf   :  { %v554_v17 = vsel %vm217_vm4, %v552_v13, 0.0  ;;  %v553_v15 = vadd.f32 %v549_v59, %v1155_v47  ;;  %v970_v47 = vld [vmem:[#allocation2 + $0x78] sm:$0xff]   ;;  %v689_v58 = vrot.slane %v1215_v36, %v688_v57  ;;  %925 = vmatprep.subr.bf16.mxu0 %v1066_v1  ;;  %v973_v59 = vld [vmem:[#allocation2 + $0x90] sm:$0xff]  }
 0x5d0   :  { %555 = vadd.xlane.f32.xlu1 %v554_v17  ;;  %916 = vmatpush3.bf16.msra.mxu1 %v970_v47  ;;  %v705_v47 = vsub.s32 2, %v1210_v32 }
 0x5d1   :  { %v557_v22 = vsel %vm217_vm4, %v553_v15, 0.0  ;;  %917 = vmatprep.subr.bf16.mxu1 %v1066_v1 }
 0x5d2   :  { %926 = vmatpush3.bf16.msra.mxu0 %v973_v59 }
 0x5d4   :  { %558 = vadd.xlane.f32.xlu1 %v557_v22  ;;  %918 = vmatpush3.bf16.msra.mxu1 %v971_v6  ;;  %v706_v6 = vrot.slane %v1215_v36, %v705_v47 }
 0x65d   :  { %v556_v61 = vpop.xlane.xlu1 %555 }
 0x65e   :  { %v561_v62 = vmul.f32 0.03125, %v556_v61 }
 0x660   :  { %v563_v63 = vsub.f32 %v552_v13, %v561_v62 }
 0x661   :  { %v559_v51 = vpop.xlane.xlu1 %558 }
 0x662   :  { %v562_v0 = vmul.f32 0.03125, %v559_v51  ;;  %v565_v2 = vmul.f32 %v563_v63, %v563_v63 }
 0x664   :  { %v564_v3 = vsub.f32 %v553_v15, %v562_v0  ;;  %v567_v4 = vsel %vm217_vm4, %v565_v2, 0.0 }
 0x665   :  { %568 = vadd.xlane.f32.xlu1 %v567_v4 }
 0x666   :  { %v566_v5 = vmul.f32 %v564_v3, %v564_v3 }
 0x668   :  { %v570_v40 = vsel %vm217_vm4, %v566_v5, 0.0 }
 0x669   :  { %571 = vadd.xlane.f32.xlu1 %v570_v40 }
 0x67a   :  { %582 = vrot.lane.b32.xlu1 %v495_v37, %s1069_s1 }
 0x6f2   :  { %v569_v14 = vpop.xlane.xlu1 %568 }
 0x6f3   :  { %v573_v18 = vmul.f32 0.03125, %v569_v14 }
 0x6f5   :  { %v575_v19 = vadd.f32 1e-05, %v573_v18 }
 0x6f6   :  { %v572_v20 = vpop.xlane.xlu1 %571 }
 0x6f7   :  { %1006 = vrsqrt.f32 %v575_v19  ;;  %v574_v23 = vmul.f32 0.03125, %v572_v20 }
 0x6f9   :  { %v576_v25 = vadd.f32 1e-05, %v574_v23 }
 0x6fa   :  { %v583_v28 = vpop.permute.xlu1 %582 }
 0x6fb   :  { %1008 = vrsqrt.f32 %v576_v25 }
 0x701   :  { %v1007_v26 = vpop.eup %1006 }
 0x702   :  { %v579_v27 = vmul.f32 %v1007_v26, %v563_v63 }
 0x704   :  { %v585_v31 = vmul.f32 %v583_v28, %v579_v27 }
 0x705   :  { %v1009_v30 = vpop.eup %1008 }
 0x706   :  { %v580_v29 = vmul.f32 %v1009_v30, %v564_v3  ;;  %v590_v35 = vadd.f32 %v588_v33, %v585_v31 }
 0x708   :  { %v586_v34 = vmul.f32 %v583_v28, %v580_v29 }
 0x70a   :  { %v591_v37 = vadd.f32 %v588_v33, %v586_v34 }
 0x70c   :  { %v596_v38 = vpack.c.bf16 %v591_v37, %v590_v35 }
 0x70e   :  { %920 = vmatmul.mubr.msk.bf16.vlgmr.msra.gmra.mrb[12].mxu1 %vm217_vm4, %v596_v38 }
 0x7e1   :  { %v649_v39 = vpop.f32.mrb[12].mxu1 }
 0x7e2   :  { %v650_v41 = vadd.f32 %v649_v39, %v610_v24  ;;  %v921_v42 = vpop.f32.mrb[13].mxu1 }
 0x7e3   :  { %v652_v43 = vpop.f32.mrb[14].mxu1 }
 0x7e4   :  { %v656_v44 = vmax.f32 %v650_v41, 0.0  ;;  %v653_v45 = vadd.f32 %v652_v43, %v610_v24  ;;  %v922_v46 = vpop.f32.mrb[15].mxu1 }
 0x7e6   :  { %v657_v48 = vmax.f32 %v653_v45, 0.0  ;;  %v658_v49 = vadd.f32 %v656_v44, %v590_v35 }
 0x7e8   :  { %v660_v50 = vsel %vm217_vm4, %v658_v49, 0.0  ;;  %v659_v52 = vadd.f32 %v657_v48, %v591_v37 }
 0x7e9   :  { %661 = vadd.xlane.f32.xlu0 %v660_v50 }
 0x7ea   :  { %v663_v11 = vsel %vm217_vm4, %v659_v52, 0.0 }
 0x7eb   :  { %664 = vadd.xlane.f32.xlu1 %v663_v11 }
 0x876   :  { %v662_v53 = vpop.xlane.xlu0 %661 }
 0x877   :  { %v666_v9 = vmul.f32 0.03125, %v662_v53 }
 0x878   :  { %v665_v54 = vpop.xlane.xlu1 %664 }
 0x879   :  { %v668_v8 = vsub.f32 %v658_v49, %v666_v9  ;;  %v667_v12 = vmul.f32 0.03125, %v665_v54 }
 0x87b   :  { %v669_v7 = vsub.f32 %v659_v52, %v667_v12  ;;  %v670_v10 = vmul.f32 %v668_v8, %v668_v8 }
 0x87d   :  { %v672_v55 = vsel %vm217_vm4, %v670_v10, 0.0  ;;  %v671_v56 = vmul.f32 %v669_v7, %v669_v7 }
 0x87e   :  { %673 = vadd.xlane.f32.xlu0 %v672_v55 }
 0x87f   :  { %v675_v16 = vsel %vm217_vm4, %v671_v56, 0.0 }
 0x882   :  { %676 = vadd.xlane.f32.xlu0 %v675_v16 }
 0x898   :  { %693 = vrot.lane.b32.xlu0 %v689_v58, %s1069_s1 }
 0x90b   :  { %v674_v60 = vpop.xlane.xlu0 %673 }
 0x90c   :  { %v678_v13 = vmul.f32 0.03125, %v674_v60 }
 0x90e   :  { %v680_v17 = vadd.f32 1e-05, %v678_v13 }
 0x90f   :  { %v677_v15 = vpop.xlane.xlu0 %676 }
 0x910   :  { %1010 = vrsqrt.f32 %v680_v17  ;;  %v679_v22 = vmul.f32 0.03125, %v677_v15 }
 0x912   :  { %v681_v61 = vadd.f32 1e-05, %v679_v22 }
 0x913   :  { %v694_v3 = vpop.permute.xlu0 %693 }
 0x914   :  { %1012 = vrsqrt.f32 %v681_v61 }
 0x91a   :  { %v1011_v62 = vpop.eup %1010 }
 0x91b   :  { %v684_v63 = vmul.f32 %v1011_v62, %v668_v8 }
 0x91d   :  { %v690_v2 = vmul.f32 %v689_v58, %v684_v63 }
 0x91e   :  { %v1013_v51 = vpop.eup %1012 }
 0x91f   :  { %v685_v0 = vmul.f32 %v1013_v51, %v669_v7  ;;  %v696_v1 = vadd.f32 %v694_v3, %v690_v2 }
 0x921   :  { %v691_v4 = vmul.f32 %v689_v58, %v685_v0 }
 0x923   :  { %v697_v5 = vadd.f32 %v694_v3, %v691_v4 }
 0x925   :  { %v702_v40 = vpack.c.bf16 %v697_v5, %v696_v1 }
 0x927   :  { %928 = vmatmul.mubr.msk.bf16.vlgmr.msra.gmra.mrb[12].mxu0 %vm217_vm4, %v702_v40 }
 0x9fa   :  { %v756_v14 = vpop.f32.mrb[12].mxu0 }
 0x9fb   :  { %v757_v18 = vadd.f32 %v756_v14, %v706_v6  ;;  %v929_v19 = vpop.f32.mrb[13].mxu0 }
 0x9fc   :  { %v759_v20 = vpop.f32.mrb[14].mxu0 }
 0x9fd   :  { %763 = vst [vmem:[#allocation5] sm:$0xff] %v757_v18  ;;  %v760_v23 = vadd.f32 %v759_v20, %v706_v6  ;;  %v930_v25 = vpop.f32.mrb[15].mxu0 }
 0x9ff   :  { %764 = vst [vmem:[#allocation5 + $0x8] sm:$0xff] %v760_v23 }
 0xa00   :  { %1047 = shalt.err (!%p1044_p12)
}
 0xa01   :  { %s1048_s4 = scalar_lea.hbm %s1273_s2, 256 }
 0xa02   :  { %p1049_p13 = scmp.ne.s32.totalorder %s1273_s2, %s1048_s4  ;;  %p1052_p0 = scmp.lt.u32.totalorder %s1048_s4, %s1273_s2 }
 0xa04   :  { %p1054_p1 = pnand %p1052_p0, %p1049_p13 }
 0xa06   :  { %1057 = shalt.err (!%p1054_p1)
}
 0xa07   :  { %s1071_s9 = smov 128   ;;  %s1072_s10 = smov 8  }
 0xa08   :  { %776 = dma.vmem_to_hbm [thread:$0]  %s771_s28, 256, %s1273_s2, [#allocation4], %s1071_s9, %s1071_s9, %s1072_s10  }
 0xa09   :  { %1060 = dma.done.wait [#allocation4], 256  }
 0xa0a   :  { %1061 = vsyncadd [#allocation4], 4294967040 }
 0xa0b   :  { %780 = vsyncpa [#allocation3], 1 }
 0xa0c   :  { %781 = vsyncpa [#allocation4], 1 }

</bundles_post_ra>
